<compile_context>
chip_gen: v6e
topology: v6e:2x2x1
jax: 0.10.0
libtpu: 0.0.40
codegen_flags: <defaults>
</compile_context>

<pallas_src>
import functools

import jax
import jax.numpy as jnp
from jax.experimental import pallas as pl
from jax.experimental.pallas import tpu as pltpu


def _msel_new_kernel(xc_ref, sqc_ref, sqr_ref, tcol_ref, trow_ref, fcol_ref,
                     frow_ref, rgb_ref, ir_ref, *, row_tile):
    i = pl.program_id(0)

    # Single x stream: slice this step's row tile out of the resident column
    # copy (aligned sublane slice; no extra HBM DMA).
    row_start = pl.multiple_of(i * row_tile, row_tile)
    xc = xc_ref[...]                                   # (N, D)  mxu dtype
    xr = xc_ref[pl.ds(row_start, row_tile), :]         # (T, D)

    sq_r = sqc_ref[...]                                # (T, 1) f32 (precomputed)
    sq_c = sqr_ref[...]                                # (1, N) f32 (precomputed)
    t_col = tcol_ref[...]                              # (T, 1) int32
    t_row = trow_ref[...]                              # (1, N) int32
    f_col = fcol_ref[...]                              # (T, 1) int32
    f_row = frow_ref[...]                              # (1, N) int32

    T = row_tile
    N = xc.shape[0]

    # ---- pairwise euclidean distances (pdist_torch), gram on the MXU ----
    gram = jnp.einsum("td,nd->tn", xr, xc,
                      preferred_element_type=jnp.float32)           # (T, N) f32
    dist = jnp.sqrt(jnp.maximum(sq_r + sq_c - 2.0 * gram, 1e-12))   # (T, N) f32

    # ---- boolean masks built in-kernel (no N^2 HBM traffic, no f32 products) ----
    # Assumes flag values are in {0, 1} (modality flag), as in the torch module.
    is_pos = t_col == t_row                                         # (T, N)
    same_mod = f_col == f_row                                       # (T, N)
    col_ids = jax.lax.broadcasted_iota(jnp.int32, (T, N), 1)
    row_ids = jax.lax.broadcasted_iota(jnp.int32, (T, 1), 0) + row_start
    off_diag = col_ids != row_ids                                   # (T, N)

    intra_mask = jnp.logical_and(jnp.logical_and(is_pos, same_mod), off_diag)
    cross_mask = jnp.logical_and(is_pos, jnp.logical_not(same_mod))

    # ---- per-row masked means ----
    # dist >= sqrt(1e-12) = 1e-6 everywhere, so torch's count_nonzero(dist*mask)
    # equals the mask count.
    intra_cnt = jnp.sum(intra_mask.astype(jnp.float32), axis=1, keepdims=True)
    cross_cnt = jnp.sum(cross_mask.astype(jnp.float32), axis=1, keepdims=True)
    intra_sum = jnp.sum(jnp.where(intra_mask, dist, 0.0), axis=1, keepdims=True)
    cross_sum = jnp.sum(jnp.where(cross_mask, dist, 0.0), axis=1, keepdims=True)

    limit = jnp.logical_and(intra_cnt > 0.0, cross_cnt > 0.0)        # (T, 1)
    intra_mean = jnp.where(limit, intra_sum / jnp.maximum(intra_cnt, 1.0), 0.0)
    cross_mean = jnp.where(limit, cross_sum / jnp.maximum(cross_cnt, 1.0), 0.0)
    diff2 = jnp.square(cross_mean - intra_mean)                      # (T, 1)

    # Per-modality partial sums of diff2 over this row tile; the /n_rgb, /n_ir
    # normalization and the final 0.5 factor happen in the wrapper.
    part_rgb = jnp.sum(jnp.where(f_col == 0, diff2, 0.0), keepdims=True)  # (1,1)
    part_ir = jnp.sum(jnp.where(f_col == 1, diff2, 0.0), keepdims=True)   # (1,1)

    @pl.when(i == 0)
    def _():
        rgb_ref[...] = jnp.zeros_like(rgb_ref)
        ir_ref[...] = jnp.zeros_like(ir_ref)

    rgb_ref[...] = rgb_ref[...] + part_rgb
    ir_ref[...] = ir_ref[...] + part_ir


def _pick_row_tile(N, D, mxu_bytes, budget_bytes):
    """Largest row tile (divisor of N, 8-aligned) whose VMEM footprint fits."""
    def footprint(t):
        col_block = 2 * N * D * mxu_bytes      # resident column copy (worst case 2-buffered)
        tn_temps = 8 * t * N * 4               # live (T, N) f32/bool temporaries
        row_stuff = 2 * t * D * mxu_bytes + 16 * t * 4
        return col_block + tn_temps + row_stuff

    for cand in (512, 256, 128, 64, 32, 16, 8):
        if cand <= N and N % cand == 0 and footprint(cand) <= budget_bytes:
            return cand, footprint(cand)
    if N % 8 == 0 and N > 8:
        # Huge N: smallest aligned tile; a column-tiled (flash-style) variant is
        # the structural follow-up for N where even this exceeds the budget.
        return 8, footprint(8)
    return N, footprint(N)


def msel_new_pallas(inputs, targets, flag, num_pos=None, feat_norm="no",
                    mxu_dtype=jnp.bfloat16):
    """inputs: (N, D) float; targets: (N,) int; flag: (N,) int {0: rgb, 1: ir}."""
    del num_pos  # stored by the torch module but unused in MSEL_new.forward
    x = jnp.asarray(inputs, jnp.float32)
    if feat_norm == "yes":
        x = x / jnp.maximum(jnp.linalg.norm(x, axis=-1, keepdims=True), 1e-12)
    N, D = x.shape
    t = jnp.asarray(targets, jnp.int32)
    f = jnp.asarray(flag, jnp.int32)

    # Squared norms computed once here (f32), never recomputed per grid step.
    sq = jnp.sum(x * x, axis=1)
    sq_col, sq_row = sq.reshape(N, 1), sq.reshape(1, N)
    t_col, t_row = t.reshape(N, 1), t.reshape(1, N)
    f_col, f_row = f.reshape(N, 1), f.reshape(1, N)

    x_mxu = x.astype(mxu_dtype)
    mxu_bytes = jnp.dtype(mxu_dtype).itemsize

    try:
        vmem_cap = int(pltpu.get_tpu_info().vmem_capacity_bytes)
    except Exception:  # fall back to the most constrained generation (v7x)
        vmem_cap = 64 << 20
    row_tile, fp_bytes = _pick_row_tile(N, D, mxu_bytes, int(vmem_cap * 0.6))
    grid = (N // row_tile,)
    vmem_limit = int(min(max(int(fp_bytes * 1.5), 32 << 20), int(vmem_cap * 0.9)))

    kernel = functools.partial(_msel_new_kernel, row_tile=row_tile)
    out_shape = (jax.ShapeDtypeStruct((1, 1), jnp.float32),
                 jax.ShapeDtypeStruct((1, 1), jnp.float32))
    out_specs = (pl.BlockSpec((1, 1), lambda i: (0, 0)),
                 pl.BlockSpec((1, 1), lambda i: (0, 0)))

    def build(single_buffer_invariants):
        def inv_spec(shape):
            # Grid-invariant column-side inputs: fetched once, single-buffered.
            if single_buffer_invariants:
                return pl.BlockSpec(shape, lambda i: (0, 0),
                                    pipeline_mode=pl.Buffered(1))
            return pl.BlockSpec(shape, lambda i: (0, 0))

        in_specs = [
            inv_spec((N, D)),                                # x, resident column copy
            pl.BlockSpec((row_tile, 1), lambda i: (i, 0)),   # sq (rows)
            inv_spec((1, N)),                                # sq (cols)
            pl.BlockSpec((row_tile, 1), lambda i: (i, 0)),   # targets (rows)
            inv_spec((1, N)),                                # targets (cols)
            pl.BlockSpec((row_tile, 1), lambda i: (i, 0)),   # flag (rows)
            inv_spec((1, N)),                                # flag (cols)
        ]
        return pl.pallas_call(
            kernel,
            out_shape=out_shape,
            grid=grid,
            in_specs=in_specs,
            out_specs=out_specs,
            compiler_params=pltpu.CompilerParams(
                dimension_semantics=("arbitrary",),
                vmem_limit_bytes=vmem_limit),
        )

    args = (x_mxu, sq_col, sq_row, t_col, t_row, f_col, f_row)
    try:
        sum_rgb, sum_ir = build(True)(*args)
    except Exception:
        # Fallback for JAX versions without BlockSpec pipeline_mode support.
        sum_rgb, sum_ir = build(False)(*args)

    # Final normalization outside the kernel (removes per-step divides and the
    # (1, N) count reductions).  Like the torch module, a batch containing only
    # one modality degenerates (division by zero).
    n_rgb = jnp.sum((f == 0).astype(jnp.float32))
    n_ir = jnp.sum((f == 1).astype(jnp.float32))
    return 0.5 * (sum_rgb[0, 0] / n_rgb + sum_ir[0, 0] / n_ir)


# ----------------- pure-JAX reference (faithful to the torch code) -----------------
def msel_new_reference(inputs, targets, flag):
    x = inputs.astype(jnp.float32)
    sq = jnp.sum(x * x, axis=1, keepdims=True)
    dist = jnp.sqrt(jnp.maximum(sq + sq.T - 2.0 * (x @ x.T), 1e-12))
    is_pos = targets[:, None] == targets[None, :]

    rgb = jnp.nonzero(flag == 0)[0]  # concrete (eager) indices
    ir = jnp.nonzero(flag == 1)[0]

    def sub(m, r, c):
        return m[jnp.ix_(r, c)]

    d_intra_rgb, d_cross_rgb = sub(dist, rgb, rgb), sub(dist, rgb, ir)
    d_intra_ir, d_cross_ir = sub(dist, ir, ir), sub(dist, ir, rgb)
    p_intra_rgb, p_cross_rgb = sub(is_pos, rgb, rgb), sub(is_pos, rgb, ir)
    p_intra_ir, p_cross_ir = sub(is_pos, ir, ir), sub(is_pos, ir, rgb)

    # torch's eye.ne(diag_embed(diag)) == off-diagonal mask
    p_intra_rgb = p_intra_rgb & ~jnp.eye(len(rgb), dtype=bool)
    p_intra_ir = p_intra_ir & ~jnp.eye(len(ir), dtype=bool)

    limit_rgb = (jnp.any(p_intra_rgb, 1, keepdims=True)
                 & jnp.any(p_cross_rgb, 1, keepdims=True))
    limit_ir = (jnp.any(p_intra_ir, 1, keepdims=True)
                & jnp.any(p_cross_ir, 1, keepdims=True))

    def masked_mean(d, p, limit):
        v = d * p.astype(jnp.float32) * limit.astype(jnp.float32)
        cnt = jnp.count_nonzero(v, axis=1)
        return jnp.where(cnt > 0, jnp.sum(v, axis=1) / cnt, 0.0)

    intra_mean_rgb = masked_mean(d_intra_rgb, p_intra_rgb, limit_rgb)
    intra_mean_ir = masked_mean(d_intra_ir, p_intra_ir, limit_ir)
    cross_mean_rgb = masked_mean(d_cross_rgb, p_cross_rgb, limit_rgb)
    cross_mean_ir = masked_mean(d_cross_ir, p_cross_ir, limit_ir)

    return (jnp.mean((cross_mean_rgb - intra_mean_rgb) ** 2)
            + jnp.mean((cross_mean_ir - intra_mean_ir) ** 2)) / 2.0


if __name__ == "__main__":
    # 2 identities x 4 samples per identity per modality -> N=16, D=32
    key = jax.random.PRNGKey(0)
    N, D, num_pos = 16, 32, 4
    inputs = jax.random.normal(key, (N, D), dtype=jnp.float32)
    targets = jnp.array([0, 0, 0, 0, 1, 1, 1, 1,
                         0, 0, 0, 0, 1, 1, 1, 1], dtype=jnp.int32)
    flag = jnp.array([0] * 8 + [1] * 8, dtype=jnp.int32)

    ref = msel_new_reference(inputs, targets, flag)

    # f32-MXU path: validates the kernel math tightly against the f32 reference.
    loss_f32 = jax.block_until_ready(
        msel_new_pallas(inputs, targets, flag, num_pos, mxu_dtype=jnp.float32))
    assert jnp.allclose(loss_f32, ref, rtol=1e-4, atol=1e-6), (loss_f32, ref)

    # Default bf16-MXU path (performance mode): looser tolerance per review.
    loss_bf16 = jax.block_until_ready(
        msel_new_pallas(inputs, targets, flag, num_pos))
    assert jnp.allclose(loss_bf16, ref, rtol=1e-1, atol=5e-2), (loss_bf16, ref)

    print("KERNEL_OK")
</pallas_src>

<mosaic_0001>
module attributes {stable_mosaic.version = 11 : i64} {
  func.func @_msel_new_kernel(%arg0: i32, %arg1: memref<16x32xf32, #tpu.memory_space<vmem>>, %arg2: memref<16x1xf32, #tpu.memory_space<vmem>>, %arg3: memref<1x16xf32, #tpu.memory_space<vmem>>, %arg4: memref<16x1xi32, #tpu.memory_space<vmem>>, %arg5: memref<1x16xi32, #tpu.memory_space<vmem>>, %arg6: memref<16x1xi32, #tpu.memory_space<vmem>>, %arg7: memref<1x16xi32, #tpu.memory_space<vmem>>, %arg8: memref<1x1xf32, #tpu.memory_space<vmem>>, %arg9: memref<1x1xf32, #tpu.memory_space<vmem>>) attributes {dimension_semantics = [#tpu.dimension_semantics<arbitrary>], iteration_bounds = array<i64: 1>, scalar_prefetch = 0 : i64, scratch_operands = 0 : i64, tpu.core_type = #tpu.core_type<tc>, window_params = [{pipeline_mode = #tpu.pipeline_mode<synchronous>, transform_indices = @transform_0, window_bounds = array<i64: 16, 32>}, {transform_indices = @transform_1, window_bounds = array<i64: 16, 1>}, {pipeline_mode = #tpu.pipeline_mode<synchronous>, transform_indices = @transform_2, window_bounds = array<i64: 1, 16>}, {transform_indices = @transform_3, window_bounds = array<i64: 16, 1>}, {pipeline_mode = #tpu.pipeline_mode<synchronous>, transform_indices = @transform_4, window_bounds = array<i64: 1, 16>}, {transform_indices = @transform_5, window_bounds = array<i64: 16, 1>}, {pipeline_mode = #tpu.pipeline_mode<synchronous>, transform_indices = @transform_6, window_bounds = array<i64: 1, 16>}, {pipeline_mode = #tpu.pipeline_mode<synchronous>, transform_indices = @transform_7, window_bounds = array<i64: 1, 1>}, {pipeline_mode = #tpu.pipeline_mode<synchronous>, transform_indices = @transform_8, window_bounds = array<i64: 1, 1>}]} {
    %c16_i32 = arith.constant 16 : i32
    %0 = arith.muli %arg0, %c16_i32 : i32
    %1 = tpu.assume_multiple %0, 16 : i32
    %c0 = arith.constant 0 : index
    %c0_0 = arith.constant 0 : index
    %2 = vector.load %arg1[%c0, %c0_0] : memref<16x32xf32, #tpu.memory_space<vmem>>, vector<16x32xf32>
    %3 = arith.index_cast %1 : i32 to index
    %c0_1 = arith.constant 0 : index
    %4 = vector.load %arg1[%3, %c0_1] : memref<16x32xf32, #tpu.memory_space<vmem>>, vector<16x32xf32>
    %c0_2 = arith.constant 0 : index
    %c0_3 = arith.constant 0 : index
    %5 = vector.load %arg2[%c0_2, %c0_3] : memref<16x1xf32, #tpu.memory_space<vmem>>, vector<16x1xf32>
    %c0_4 = arith.constant 0 : index
    %c0_5 = arith.constant 0 : index
    %6 = vector.load %arg3[%c0_4, %c0_5] : memref<1x16xf32, #tpu.memory_space<vmem>>, vector<1x16xf32>
    %c0_6 = arith.constant 0 : index
    %c0_7 = arith.constant 0 : index
    %7 = vector.load %arg4[%c0_6, %c0_7] : memref<16x1xi32, #tpu.memory_space<vmem>>, vector<16x1xi32>
    %c0_8 = arith.constant 0 : index
    %c0_9 = arith.constant 0 : index
    %8 = vector.load %arg5[%c0_8, %c0_9] : memref<1x16xi32, #tpu.memory_space<vmem>>, vector<1x16xi32>
    %c0_10 = arith.constant 0 : index
    %c0_11 = arith.constant 0 : index
    %9 = vector.load %arg6[%c0_10, %c0_11] : memref<16x1xi32, #tpu.memory_space<vmem>>, vector<16x1xi32>
    %c0_12 = arith.constant 0 : index
    %c0_13 = arith.constant 0 : index
    %10 = vector.load %arg7[%c0_12, %c0_13] : memref<1x16xi32, #tpu.memory_space<vmem>>, vector<1x16xi32>
    "tpu.trace_start"() <{level = 10 : i32, message = "td,nd->tn"}> : () -> ()
    %cst = arith.constant dense<0.000000e+00> : vector<16x16xf32>
    %11 = tpu.matmul %4, %2, %cst {dimension_numbers = #tpu.dot_dimension_numbers<[1], [1], [0], [0], [0, 0, 1, 0], [], []>} : vector<16x32xf32>, vector<16x32xf32>, vector<16x16xf32> -> vector<16x16xf32>
    "tpu.trace_stop"() : () -> ()
    %12 = vector.broadcast %5 : vector<16x1xf32> to vector<16x16xf32>
    %13 = vector.broadcast %6 : vector<1x16xf32> to vector<16x16xf32>
    %14 = arith.addf %12, %13 : vector<16x16xf32>
    %cst_14 = arith.constant 2.000000e+00 : f32
    %15 = vector.broadcast %cst_14 : f32 to vector<16x16xf32>
    %16 = arith.mulf %15, %11 : vector<16x16xf32>
    %17 = arith.subf %14, %16 : vector<16x16xf32>
    %cst_15 = arith.constant 9.99999996E-13 : f32
    %18 = vector.broadcast %cst_15 : f32 to vector<16x16xf32>
    %19 = arith.maximumf %17, %18 : vector<16x16xf32>
    %20 = math.sqrt %19 : vector<16x16xf32>
    %21 = vector.broadcast %7 : vector<16x1xi32> to vector<16x16xi32>
    %22 = vector.broadcast %8 : vector<1x16xi32> to vector<16x16xi32>
    %23 = arith.cmpi eq, %21, %22 : vector<16x16xi32>
    %24 = vector.broadcast %9 : vector<16x1xi32> to vector<16x16xi32>
    %25 = vector.broadcast %10 : vector<1x16xi32> to vector<16x16xi32>
    %26 = arith.cmpi eq, %24, %25 : vector<16x16xi32>
    %27 = tpu.iota {dimensions = array<i32: 1>} : vector<16x16xi32>
    %28 = tpu.iota {dimensions = array<i32: 0>} : vector<16x1xi32>
    %29 = vector.broadcast %1 : i32 to vector<16x1xi32>
    %30 = arith.addi %28, %29 : vector<16x1xi32>
    %31 = vector.broadcast %30 : vector<16x1xi32> to vector<16x16xi32>
    %32 = arith.cmpi ne, %27, %31 : vector<16x16xi32>
    %33 = arith.andi %23, %26 : vector<16x16xi1>
    %34 = arith.andi %33, %32 : vector<16x16xi1>
    %cst_16 = arith.constant dense<true> : vector<16x16xi1>
    %35 = arith.xori %26, %cst_16 : vector<16x16xi1>
    %36 = arith.andi %23, %35 : vector<16x16xi1>
    %37 = arith.extui %34 : vector<16x16xi1> to vector<16x16xi32>
    %38 = arith.sitofp %37 : vector<16x16xi32> to vector<16x16xf32>
    %cst_17 = arith.constant dense<0.000000e+00> : vector<16xf32>
    %39 = vector.multi_reduction <add>, %38, %cst_17 [1] : vector<16x16xf32> to vector<16xf32>
    %40 = vector.shape_cast %39 : vector<16xf32> to vector<16x1xf32>
    %41 = arith.extui %36 : vector<16x16xi1> to vector<16x16xi32>
    %42 = arith.sitofp %41 : vector<16x16xi32> to vector<16x16xf32>
    %cst_18 = arith.constant dense<0.000000e+00> : vector<16xf32>
    %43 = vector.multi_reduction <add>, %42, %cst_18 [1] : vector<16x16xf32> to vector<16xf32>
    %44 = vector.shape_cast %43 : vector<16xf32> to vector<16x1xf32>
    %cst_19 = arith.constant 0.000000e+00 : f32
    %45 = vector.broadcast %cst_19 : f32 to vector<16x16xf32>
    %46 = arith.select %34, %20, %45 : vector<16x16xi1>, vector<16x16xf32>
    %cst_20 = arith.constant dense<0.000000e+00> : vector<16xf32>
    %47 = vector.multi_reduction <add>, %46, %cst_20 [1] : vector<16x16xf32> to vector<16xf32>
    %48 = vector.shape_cast %47 : vector<16xf32> to vector<16x1xf32>
    %cst_21 = arith.constant 0.000000e+00 : f32
    %49 = vector.broadcast %cst_21 : f32 to vector<16x16xf32>
    %50 = arith.select %36, %20, %49 : vector<16x16xi1>, vector<16x16xf32>
    %cst_22 = arith.constant dense<0.000000e+00> : vector<16xf32>
    %51 = vector.multi_reduction <add>, %50, %cst_22 [1] : vector<16x16xf32> to vector<16xf32>
    %52 = vector.shape_cast %51 : vector<16xf32> to vector<16x1xf32>
    %cst_23 = arith.constant 0.000000e+00 : f32
    %53 = vector.broadcast %cst_23 : f32 to vector<16x1xf32>
    %54 = arith.cmpf ogt, %40, %53 : vector<16x1xf32>
    %cst_24 = arith.constant 0.000000e+00 : f32
    %55 = vector.broadcast %cst_24 : f32 to vector<16x1xf32>
    %56 = arith.cmpf ogt, %44, %55 : vector<16x1xf32>
    %57 = arith.andi %54, %56 : vector<16x1xi1>
    %cst_25 = arith.constant 1.000000e+00 : f32
    %58 = vector.broadcast %cst_25 : f32 to vector<16x1xf32>
    %59 = arith.maximumf %40, %58 : vector<16x1xf32>
    %60 = arith.divf %48, %59 : vector<16x1xf32>
    %cst_26 = arith.constant 0.000000e+00 : f32
    %61 = vector.broadcast %cst_26 : f32 to vector<16x1xf32>
    %62 = arith.select %57, %60, %61 : vector<16x1xi1>, vector<16x1xf32>
    %cst_27 = arith.constant 1.000000e+00 : f32
    %63 = vector.broadcast %cst_27 : f32 to vector<16x1xf32>
    %64 = arith.maximumf %44, %63 : vector<16x1xf32>
    %65 = arith.divf %52, %64 : vector<16x1xf32>
    %cst_28 = arith.constant 0.000000e+00 : f32
    %66 = vector.broadcast %cst_28 : f32 to vector<16x1xf32>
    %67 = arith.select %57, %65, %66 : vector<16x1xi1>, vector<16x1xf32>
    %68 = arith.subf %67, %62 : vector<16x1xf32>
    %69 = arith.mulf %68, %68 : vector<16x1xf32>
    %c0_i32 = arith.constant 0 : i32
    %70 = vector.broadcast %c0_i32 : i32 to vector<16x1xi32>
    %71 = arith.cmpi eq, %9, %70 : vector<16x1xi32>
    %cst_29 = arith.constant 0.000000e+00 : f32
    %72 = vector.broadcast %cst_29 : f32 to vector<16x1xf32>
    %73 = arith.select %71, %69, %72 : vector<16x1xi1>, vector<16x1xf32>
    %74 = vector.shape_cast %73 : vector<16x1xf32> to vector<1x16x1xf32>
    %cst_30 = arith.constant dense<0.000000e+00> : vector<1xf32>
    %75 = vector.multi_reduction <add>, %74, %cst_30 [1, 2] : vector<1x16x1xf32> to vector<1xf32>
    %76 = vector.shape_cast %75 : vector<1xf32> to vector<1x1x1xf32>
    %77 = vector.extract %76[0, 0, 0] : f32 from vector<1x1x1xf32>
    %78 = vector.broadcast %77 : f32 to vector<1x1xf32>
    %c1_i32 = arith.constant 1 : i32
    %79 = vector.broadcast %c1_i32 : i32 to vector<16x1xi32>
    %80 = arith.cmpi eq, %9, %79 : vector<16x1xi32>
    %cst_31 = arith.constant 0.000000e+00 : f32
    %81 = vector.broadcast %cst_31 : f32 to vector<16x1xf32>
    %82 = arith.select %80, %69, %81 : vector<16x1xi1>, vector<16x1xf32>
    %83 = vector.shape_cast %82 : vector<16x1xf32> to vector<1x16x1xf32>
    %cst_32 = arith.constant dense<0.000000e+00> : vector<1xf32>
    %84 = vector.multi_reduction <add>, %83, %cst_32 [1, 2] : vector<1x16x1xf32> to vector<1xf32>
    %85 = vector.shape_cast %84 : vector<1xf32> to vector<1x1x1xf32>
    %86 = vector.extract %85[0, 0, 0] : f32 from vector<1x1x1xf32>
    %87 = vector.broadcast %86 : f32 to vector<1x1xf32>
    %c0_i32_33 = arith.constant 0 : i32
    %88 = arith.cmpi eq, %arg0, %c0_i32_33 : i32
    %89 = arith.extui %88 : i1 to i32
    %c0_i32_34 = arith.constant 0 : i32
    %90 = arith.cmpi ne, %89, %c0_i32_34 : i32
    scf.if %90 {
      %cst_43 = arith.constant 0.000000e+00 : f32
      %97 = vector.broadcast %cst_43 : f32 to vector<1x1xf32>
      %c0_44 = arith.constant 0 : index
      %c0_45 = arith.constant 0 : index
      %98 = vector.load %arg8[%c0_44, %c0_45] : memref<1x1xf32, #tpu.memory_space<vmem>>, vector<1x1xf32>
      tpu.vector_store %arg8[%c0_44, %c0_45], %97 {strides = array<i32>} : memref<1x1xf32, #tpu.memory_space<vmem>>, vector<1x1xf32>,
      %cst_46 = arith.constant 0.000000e+00 : f32
      %99 = vector.broadcast %cst_46 : f32 to vector<1x1xf32>
      %c0_47 = arith.constant 0 : index
      %c0_48 = arith.constant 0 : index
      %100 = vector.load %arg9[%c0_47, %c0_48] : memref<1x1xf32, #tpu.memory_space<vmem>>, vector<1x1xf32>
      tpu.vector_store %arg9[%c0_47, %c0_48], %99 {strides = array<i32>} : memref<1x1xf32, #tpu.memory_space<vmem>>, vector<1x1xf32>,
    } else {
    }
    %c0_35 = arith.constant 0 : index
    %c0_36 = arith.constant 0 : index
    %91 = vector.load %arg8[%c0_35, %c0_36] : memref<1x1xf32, #tpu.memory_space<vmem>>, vector<1x1xf32>
    %92 = arith.addf %91, %78 : vector<1x1xf32>
    %c0_37 = arith.constant 0 : index
    %c0_38 = arith.constant 0 : index
    %93 = vector.load %arg8[%c0_37, %c0_38] : memref<1x1xf32, #tpu.memory_space<vmem>>, vector<1x1xf32>
    tpu.vector_store %arg8[%c0_37, %c0_38], %92 {strides = array<i32>} : memref<1x1xf32, #tpu.memory_space<vmem>>, vector<1x1xf32>,
    %c0_39 = arith.constant 0 : index
    %c0_40 = arith.constant 0 : index
    %94 = vector.load %arg9[%c0_39, %c0_40] : memref<1x1xf32, #tpu.memory_space<vmem>>, vector<1x1xf32>
    %95 = arith.addf %94, %87 : vector<1x1xf32>
    %c0_41 = arith.constant 0 : index
    %c0_42 = arith.constant 0 : index
    %96 = vector.load %arg9[%c0_41, %c0_42] : memref<1x1xf32, #tpu.memory_space<vmem>>, vector<1x1xf32>
    tpu.vector_store %arg9[%c0_41, %c0_42], %95 {strides = array<i32>} : memref<1x1xf32, #tpu.memory_space<vmem>>, vector<1x1xf32>,
    return
  }
  func.func @transform_0(%arg0: i32) -> (i32, i32) {
    %c0_i32 = arith.constant 0 : i32
    %c0_i32_0 = arith.constant 0 : i32
    %c0_i32_1 = arith.constant 0 : i32
    return %c0_i32, %c0_i32_0 : i32, i32
  }
  func.func @transform_1(%arg0: i32) -> (i32, i32) {
    %c0_i32 = arith.constant 0 : i32
    %c0_i32_0 = arith.constant 0 : i32
    return %arg0, %c0_i32 : i32, i32
  }
  func.func @transform_2(%arg0: i32) -> (i32, i32) {
    %c0_i32 = arith.constant 0 : i32
    %c0_i32_0 = arith.constant 0 : i32
    %c0_i32_1 = arith.constant 0 : i32
    return %c0_i32, %c0_i32_0 : i32, i32
  }
  func.func @transform_3(%arg0: i32) -> (i32, i32) {
    %c0_i32 = arith.constant 0 : i32
    %c0_i32_0 = arith.constant 0 : i32
    return %arg0, %c0_i32 : i32, i32
  }
  func.func @transform_4(%arg0: i32) -> (i32, i32) {
    %c0_i32 = arith.constant 0 : i32
    %c0_i32_0 = arith.constant 0 : i32
    %c0_i32_1 = arith.constant 0 : i32
    return %c0_i32, %c0_i32_0 : i32, i32
  }
  func.func @transform_5(%arg0: i32) -> (i32, i32) {
    %c0_i32 = arith.constant 0 : i32
    %c0_i32_0 = arith.constant 0 : i32
    return %arg0, %c0_i32 : i32, i32
  }
  func.func @transform_6(%arg0: i32) -> (i32, i32) {
    %c0_i32 = arith.constant 0 : i32
    %c0_i32_0 = arith.constant 0 : i32
    %c0_i32_1 = arith.constant 0 : i32
    return %c0_i32, %c0_i32_0 : i32, i32
  }
  func.func @transform_7(%arg0: i32) -> (i32, i32) {
    %c0_i32 = arith.constant 0 : i32
    %c0_i32_0 = arith.constant 0 : i32
    %c0_i32_1 = arith.constant 0 : i32
    return %c0_i32, %c0_i32_0 : i32, i32
  }
  func.func @transform_8(%arg0: i32) -> (i32, i32) {
    %c0_i32 = arith.constant 0 : i32
    %c0_i32_0 = arith.constant 0 : i32
    %c0_i32_1 = arith.constant 0 : i32
    return %c0_i32, %c0_i32_0 : i32, i32
  }
}

module attributes {stable_mosaic.version = 11 : i64} {
  func.func @_msel_new_kernel(%arg0: i32, %arg1: memref<16x32xf32, #tpu.memory_space<vmem>>, %arg2: memref<16x1xf32, #tpu.memory_space<vmem>>, %arg3: memref<1x16xf32, #tpu.memory_space<vmem>>, %arg4: memref<16x1xi32, #tpu.memory_space<vmem>>, %arg5: memref<1x16xi32, #tpu.memory_space<vmem>>, %arg6: memref<16x1xi32, #tpu.memory_space<vmem>>, %arg7: memref<1x16xi32, #tpu.memory_space<vmem>>, %arg8: memref<1x1xf32, #tpu.memory_space<vmem>>, %arg9: memref<1x1xf32, #tpu.memory_space<vmem>>) attributes {dimension_semantics = [#tpu.dimension_semantics<arbitrary>], iteration_bounds = array<i64: 1>, scalar_prefetch = 0 : i64, scratch_operands = 0 : i64, tpu.core_type = #tpu.core_type<tc>, window_params = [{pipeline_mode = #tpu.pipeline_mode<synchronous>, transform_indices = @transform_0, window_bounds = array<i64: 16, 32>}, {transform_indices = @transform_1, window_bounds = array<i64: 16, 1>}, {pipeline_mode = #tpu.pipeline_mode<synchronous>, transform_indices = @transform_2, window_bounds = array<i64: 1, 16>}, {transform_indices = @transform_3, window_bounds = array<i64: 16, 1>}, {pipeline_mode = #tpu.pipeline_mode<synchronous>, transform_indices = @transform_4, window_bounds = array<i64: 1, 16>}, {transform_indices = @transform_5, window_bounds = array<i64: 16, 1>}, {pipeline_mode = #tpu.pipeline_mode<synchronous>, transform_indices = @transform_6, window_bounds = array<i64: 1, 16>}, {pipeline_mode = #tpu.pipeline_mode<synchronous>, transform_indices = @transform_7, window_bounds = array<i64: 1, 1>}, {pipeline_mode = #tpu.pipeline_mode<synchronous>, transform_indices = @transform_8, window_bounds = array<i64: 1, 1>}]} {
    %c16_i32 = arith.constant 16 : i32
    %0 = arith.muli %arg0, %c16_i32 : i32
    %1 = tpu.assume_multiple %0, 16 : i32
    %c0 = arith.constant 0 : index
    %c0_0 = arith.constant 0 : index
    %2 = vector.load %arg1[%c0, %c0_0] : memref<16x32xf32, #tpu.memory_space<vmem>>, vector<16x32xf32>
    %3 = arith.index_cast %1 : i32 to index
    %c0_1 = arith.constant 0 : index
    %4 = vector.load %arg1[%3, %c0_1] : memref<16x32xf32, #tpu.memory_space<vmem>>, vector<16x32xf32>
    %c0_2 = arith.constant 0 : index
    %c0_3 = arith.constant 0 : index
    %5 = vector.load %arg2[%c0_2, %c0_3] : memref<16x1xf32, #tpu.memory_space<vmem>>, vector<16x1xf32>
    %c0_4 = arith.constant 0 : index
    %c0_5 = arith.constant 0 : index
    %6 = vector.load %arg3[%c0_4, %c0_5] : memref<1x16xf32, #tpu.memory_space<vmem>>, vector<1x16xf32>
    %c0_6 = arith.constant 0 : index
    %c0_7 = arith.constant 0 : index
    %7 = vector.load %arg4[%c0_6, %c0_7] : memref<16x1xi32, #tpu.memory_space<vmem>>, vector<16x1xi32>
    %c0_8 = arith.constant 0 : index
    %c0_9 = arith.constant 0 : index
    %8 = vector.load %arg5[%c0_8, %c0_9] : memref<1x16xi32, #tpu.memory_space<vmem>>, vector<1x16xi32>
    %c0_10 = arith.constant 0 : index
    %c0_11 = arith.constant 0 : index
    %9 = vector.load %arg6[%c0_10, %c0_11] : memref<16x1xi32, #tpu.memory_space<vmem>>, vector<16x1xi32>
    %c0_12 = arith.constant 0 : index
    %c0_13 = arith.constant 0 : index
    %10 = vector.load %arg7[%c0_12, %c0_13] : memref<1x16xi32, #tpu.memory_space<vmem>>, vector<1x16xi32>
    "tpu.trace_start"() <{level = 10 : i32, message = "td,nd->tn"}> : () -> ()
    %cst = arith.constant dense<0.000000e+00> : vector<16x16xf32>
    %11 = tpu.matmul %4, %2, %cst {dimension_numbers = #tpu.dot_dimension_numbers<[1], [1], [0], [0], [0, 0, 1, 0], [], []>} : vector<16x32xf32>, vector<16x32xf32>, vector<16x16xf32> -> vector<16x16xf32>
    "tpu.trace_stop"() : () -> ()
    %12 = vector.broadcast %5 : vector<16x1xf32> to vector<16x16xf32>
    %13 = vector.broadcast %6 : vector<1x16xf32> to vector<16x16xf32>
    %14 = arith.addf %12, %13 : vector<16x16xf32>
    %cst_14 = arith.constant 2.000000e+00 : f32
    %15 = vector.broadcast %cst_14 : f32 to vector<16x16xf32>
    %16 = arith.mulf %15, %11 : vector<16x16xf32>
    %17 = arith.subf %14, %16 : vector<16x16xf32>
    %cst_15 = arith.constant 9.99999996E-13 : f32
    %18 = vector.broadcast %cst_15 : f32 to vector<16x16xf32>
    %19 = arith.maximumf %17, %18 : vector<16x16xf32>
    %20 = math.sqrt %19 : vector<16x16xf32>
    %21 = vector.broadcast %7 : vector<16x1xi32> to vector<16x16xi32>
    %22 = vector.broadcast %8 : vector<1x16xi32> to vector<16x16xi32>
    %23 = arith.cmpi eq, %21, %22 : vector<16x16xi32>
    %24 = vector.broadcast %9 : vector<16x1xi32> to vector<16x16xi32>
    %25 = vector.broadcast %10 : vector<1x16xi32> to vector<16x16xi32>
    %26 = arith.cmpi eq, %24, %25 : vector<16x16xi32>
    %27 = tpu.iota {dimensions = array<i32: 1>} : vector<16x16xi32>
    %28 = tpu.iota {dimensions = array<i32: 0>} : vector<16x1xi32>
    %29 = vector.broadcast %1 : i32 to vector<16x1xi32>
    %30 = arith.addi %28, %29 : vector<16x1xi32>
    %31 = vector.broadcast %30 : vector<16x1xi32> to vector<16x16xi32>
    %32 = arith.cmpi ne, %27, %31 : vector<16x16xi32>
    %33 = arith.andi %23, %26 : vector<16x16xi1>
    %34 = arith.andi %33, %32 : vector<16x16xi1>
    %cst_16 = arith.constant dense<true> : vector<16x16xi1>
    %35 = arith.xori %26, %cst_16 : vector<16x16xi1>
    %36 = arith.andi %23, %35 : vector<16x16xi1>
    %37 = arith.extui %34 : vector<16x16xi1> to vector<16x16xi32>
    %38 = arith.sitofp %37 : vector<16x16xi32> to vector<16x16xf32>
    %cst_17 = arith.constant dense<0.000000e+00> : vector<16xf32>
    %39 = vector.multi_reduction <add>, %38, %cst_17 [1] : vector<16x16xf32> to vector<16xf32>
    %40 = vector.shape_cast %39 : vector<16xf32> to vector<16x1xf32>
    %41 = arith.extui %36 : vector<16x16xi1> to vector<16x16xi32>
    %42 = arith.sitofp %41 : vector<16x16xi32> to vector<16x16xf32>
    %cst_18 = arith.constant dense<0.000000e+00> : vector<16xf32>
    %43 = vector.multi_reduction <add>, %42, %cst_18 [1] : vector<16x16xf32> to vector<16xf32>
    %44 = vector.shape_cast %43 : vector<16xf32> to vector<16x1xf32>
    %cst_19 = arith.constant 0.000000e+00 : f32
    %45 = vector.broadcast %cst_19 : f32 to vector<16x16xf32>
    %46 = arith.select %34, %20, %45 : vector<16x16xi1>, vector<16x16xf32>
    %cst_20 = arith.constant dense<0.000000e+00> : vector<16xf32>
    %47 = vector.multi_reduction <add>, %46, %cst_20 [1] : vector<16x16xf32> to vector<16xf32>
    %48 = vector.shape_cast %47 : vector<16xf32> to vector<16x1xf32>
    %cst_21 = arith.constant 0.000000e+00 : f32
    %49 = vector.broadcast %cst_21 : f32 to vector<16x16xf32>
    %50 = arith.select %36, %20, %49 : vector<16x16xi1>, vector<16x16xf32>
    %cst_22 = arith.constant dense<0.000000e+00> : vector<16xf32>
    %51 = vector.multi_reduction <add>, %50, %cst_22 [1] : vector<16x16xf32> to vector<16xf32>
    %52 = vector.shape_cast %51 : vector<16xf32> to vector<16x1xf32>
    %cst_23 = arith.constant 0.000000e+00 : f32
    %53 = vector.broadcast %cst_23 : f32 to vector<16x1xf32>
    %54 = arith.cmpf ogt, %40, %53 : vector<16x1xf32>
    %cst_24 = arith.constant 0.000000e+00 : f32
    %55 = vector.broadcast %cst_24 : f32 to vector<16x1xf32>
    %56 = arith.cmpf ogt, %44, %55 : vector<16x1xf32>
    %57 = arith.andi %54, %56 : vector<16x1xi1>
    %cst_25 = arith.constant 1.000000e+00 : f32
    %58 = vector.broadcast %cst_25 : f32 to vector<16x1xf32>
    %59 = arith.maximumf %40, %58 : vector<16x1xf32>
    %60 = arith.divf %48, %59 : vector<16x1xf32>
    %cst_26 = arith.constant 0.000000e+00 : f32
    %61 = vector.broadcast %cst_26 : f32 to vector<16x1xf32>
    %62 = arith.select %57, %60, %61 : vector<16x1xi1>, vector<16x1xf32>
    %cst_27 = arith.constant 1.000000e+00 : f32
    %63 = vector.broadcast %cst_27 : f32 to vector<16x1xf32>
    %64 = arith.maximumf %44, %63 : vector<16x1xf32>
    %65 = arith.divf %52, %64 : vector<16x1xf32>
    %cst_28 = arith.constant 0.000000e+00 : f32
    %66 = vector.broadcast %cst_28 : f32 to vector<16x1xf32>
    %67 = arith.select %57, %65, %66 : vector<16x1xi1>, vector<16x1xf32>
    %68 = arith.subf %67, %62 : vector<16x1xf32>
    %69 = arith.mulf %68, %68 : vector<16x1xf32>
    %c0_i32 = arith.constant 0 : i32
    %70 = vector.broadcast %c0_i32 : i32 to vector<16x1xi32>
    %71 = arith.cmpi eq, %9, %70 : vector<16x1xi32>
    %cst_29 = arith.constant 0.000000e+00 : f32
    %72 = vector.broadcast %cst_29 : f32 to vector<16x1xf32>
    %73 = arith.select %71, %69, %72 : vector<16x1xi1>, vector<16x1xf32>
    %74 = vector.shape_cast %73 : vector<16x1xf32> to vector<1x16x1xf32>
    %cst_30 = arith.constant dense<0.000000e+00> : vector<1xf32>
    %75 = vector.multi_reduction <add>, %74, %cst_30 [1, 2] : vector<1x16x1xf32> to vector<1xf32>
    %76 = vector.shape_cast %75 : vector<1xf32> to vector<1x1x1xf32>
    %77 = vector.extract %76[0, 0, 0] : f32 from vector<1x1x1xf32>
    %78 = vector.broadcast %77 : f32 to vector<1x1xf32>
    %c1_i32 = arith.constant 1 : i32
    %79 = vector.broadcast %c1_i32 : i32 to vector<16x1xi32>
    %80 = arith.cmpi eq, %9, %79 : vector<16x1xi32>
    %cst_31 = arith.constant 0.000000e+00 : f32
    %81 = vector.broadcast %cst_31 : f32 to vector<16x1xf32>
    %82 = arith.select %80, %69, %81 : vector<16x1xi1>, vector<16x1xf32>
    %83 = vector.shape_cast %82 : vector<16x1xf32> to vector<1x16x1xf32>
    %cst_32 = arith.constant dense<0.000000e+00> : vector<1xf32>
    %84 = vector.multi_reduction <add>, %83, %cst_32 [1, 2] : vector<1x16x1xf32> to vector<1xf32>
    %85 = vector.shape_cast %84 : vector<1xf32> to vector<1x1x1xf32>
    %86 = vector.extract %85[0, 0, 0] : f32 from vector<1x1x1xf32>
    %87 = vector.broadcast %86 : f32 to vector<1x1xf32>
    %c0_i32_33 = arith.constant 0 : i32
    %88 = arith.cmpi eq, %arg0, %c0_i32_33 : i32
    %89 = arith.extui %88 : i1 to i32
    %c0_i32_34 = arith.constant 0 : i32
    %90 = arith.cmpi ne, %89, %c0_i32_34 : i32
    scf.if %90 {
      %cst_43 = arith.constant 0.000000e+00 : f32
      %97 = vector.broadcast %cst_43 : f32 to vector<1x1xf32>
      %c0_44 = arith.constant 0 : index
      %c0_45 = arith.constant 0 : index
      %98 = vector.load %arg8[%c0_44, %c0_45] : memref<1x1xf32, #tpu.memory_space<vmem>>, vector<1x1xf32>
      tpu.vector_store %arg8[%c0_44, %c0_45], %97 {strides = array<i32>} : memref<1x1xf32, #tpu.memory_space<vmem>>, vector<1x1xf32>,
      %cst_46 = arith.constant 0.000000e+00 : f32
      %99 = vector.broadcast %cst_46 : f32 to vector<1x1xf32>
      %c0_47 = arith.constant 0 : index
      %c0_48 = arith.constant 0 : index
      %100 = vector.load %arg9[%c0_47, %c0_48] : memref<1x1xf32, #tpu.memory_space<vmem>>, vector<1x1xf32>
      tpu.vector_store %arg9[%c0_47, %c0_48], %99 {strides = array<i32>} : memref<1x1xf32, #tpu.memory_space<vmem>>, vector<1x1xf32>,
    } else {
    }
    %c0_35 = arith.constant 0 : index
    %c0_36 = arith.constant 0 : index
    %91 = vector.load %arg8[%c0_35, %c0_36] : memref<1x1xf32, #tpu.memory_space<vmem>>, vector<1x1xf32>
    %92 = arith.addf %91, %78 : vector<1x1xf32>
    %c0_37 = arith.constant 0 : index
    %c0_38 = arith.constant 0 : index
    %93 = vector.load %arg8[%c0_37, %c0_38] : memref<1x1xf32, #tpu.memory_space<vmem>>, vector<1x1xf32>
    tpu.vector_store %arg8[%c0_37, %c0_38], %92 {strides = array<i32>} : memref<1x1xf32, #tpu.memory_space<vmem>>, vector<1x1xf32>,
    %c0_39 = arith.constant 0 : index
    %c0_40 = arith.constant 0 : index
    %94 = vector.load %arg9[%c0_39, %c0_40] : memref<1x1xf32, #tpu.memory_space<vmem>>, vector<1x1xf32>
    %95 = arith.addf %94, %87 : vector<1x1xf32>
    %c0_41 = arith.constant 0 : index
    %c0_42 = arith.constant 0 : index
    %96 = vector.load %arg9[%c0_41, %c0_42] : memref<1x1xf32, #tpu.memory_space<vmem>>, vector<1x1xf32>
    tpu.vector_store %arg9[%c0_41, %c0_42], %95 {strides = array<i32>} : memref<1x1xf32, #tpu.memory_space<vmem>>, vector<1x1xf32>,
    return
  }
  func.func @transform_0(%arg0: i32) -> (i32, i32) {
    %c0_i32 = arith.constant 0 : i32
    %c0_i32_0 = arith.constant 0 : i32
    %c0_i32_1 = arith.constant 0 : i32
    return %c0_i32, %c0_i32_0 : i32, i32
  }
  func.func @transform_1(%arg0: i32) -> (i32, i32) {
    %c0_i32 = arith.constant 0 : i32
    %c0_i32_0 = arith.constant 0 : i32
    return %arg0, %c0_i32 : i32, i32
  }
  func.func @transform_2(%arg0: i32) -> (i32, i32) {
    %c0_i32 = arith.constant 0 : i32
    %c0_i32_0 = arith.constant 0 : i32
    %c0_i32_1 = arith.constant 0 : i32
    return %c0_i32, %c0_i32_0 : i32, i32
  }
  func.func @transform_3(%arg0: i32) -> (i32, i32) {
    %c0_i32 = arith.constant 0 : i32
    %c0_i32_0 = arith.constant 0 : i32
    return %arg0, %c0_i32 : i32, i32
  }
  func.func @transform_4(%arg0: i32) -> (i32, i32) {
    %c0_i32 = arith.constant 0 : i32
    %c0_i32_0 = arith.constant 0 : i32
    %c0_i32_1 = arith.constant 0 : i32
    return %c0_i32, %c0_i32_0 : i32, i32
  }
  func.func @transform_5(%arg0: i32) -> (i32, i32) {
    %c0_i32 = arith.constant 0 : i32
    %c0_i32_0 = arith.constant 0 : i32
    return %arg0, %c0_i32 : i32, i32
  }
  func.func @transform_6(%arg0: i32) -> (i32, i32) {
    %c0_i32 = arith.constant 0 : i32
    %c0_i32_0 = arith.constant 0 : i32
    %c0_i32_1 = arith.constant 0 : i32
    return %c0_i32, %c0_i32_0 : i32, i32
  }
  func.func @transform_7(%arg0: i32) -> (i32, i32) {
    %c0_i32 = arith.constant 0 : i32
    %c0_i32_0 = arith.constant 0 : i32
    %c0_i32_1 = arith.constant 0 : i32
    return %c0_i32, %c0_i32_0 : i32, i32
  }
  func.func @transform_8(%arg0: i32) -> (i32, i32) {
    %c0_i32 = arith.constant 0 : i32
    %c0_i32_0 = arith.constant 0 : i32
    %c0_i32_1 = arith.constant 0 : i32
    return %c0_i32, %c0_i32_0 : i32, i32
  }
}

</mosaic_0001>

<bundles_post_ra>
// kernel: tpu_custom_call.1
= control target key start
LH: loop header
LB: loop body
LE: loop exit
PB: predicated region body
PF: predicated region fallthrough
CT: control target
= control target key end

     0   :  { %14 = vsyncpa [#allocation3], 0  ;;  %vm45_vm0 = vcmask 261120   ;;  %v442_v3 = vmov 0   ;;  %s601_s0 = inlined_call_operand.vmem [shape: f32[16,32], index: 0, kind: input, shape index: {}]   ;;  %s602_s1 = inlined_call_operand.vmem [shape: f32[16,1], index: 1, kind: input, shape index: {}]   ;;  %s603_s2 = inlined_call_operand.vmem [shape: f32[1,16], index: 2, kind: input, shape index: {}]   ;;  %s604_s3 = inlined_call_operand.vmem [shape: s32[16,1], index: 3, kind: input, shape index: {}]   ;;  %s605_s4 = inlined_call_operand.vmem [shape: s32[1,16], index: 4, kind: input, shape index: {}]   ;;  %s606_s5 = inlined_call_operand.vmem [shape: s32[16,1], index: 5, kind: input, shape index: {}]   ;;  %s607_s6 = inlined_call_operand.vmem [shape: s32[1,16], index: 6, kind: input, shape index: {}]   ;;  %s608_s7 = inlined_call_operand.hbm [shape: f32[1,1], index: 7, kind: output, shape index: {0}]   ;;  %s609_s8 = inlined_call_operand.hbm [shape: f32[1,1], index: 8, kind: output, shape index: {1}]  }
   0x1   :  { %v32_v0 = vld [vmem:[%s601_s0 + $0x8] sm:$0xff]  ;;  %v31_v1 = vld [vmem:[%s601_s0] sm:$0xff]  ;;  %384 = vset.pattern.permute.xlu0 %v442_v3  ;;  %385 = vset.pattern.permute.xlu1 %v442_v3 }
   0x2   :  { %v36_v2 = vld [vmem:[%s602_s1] sm:$0xff]  ;;  %368 = vmatprep.subr.msk.mxu0 %vm45_vm0, %v32_v0  ;;  %372 = vmatprep.mubr.msk.f32.mxu0 %vm45_vm0, %v31_v1  ;;  %v37_v5 = vld [vmem:[%s602_s1 + $0x8] sm:$0xff] }
   0x3   :  { %369 = vmatpush3.xpose.msk.msra.mxu0 %vm45_vm0, %v32_v0  ;;  %v39_v4 = vld [vmem:[%s604_s3] sm:$0xff]  ;;  %135 = vperm.xlu0 %384, %v36_v2  }
   0x4   :  { %370 = vmatprep.subr.msk.mxu0 %vm45_vm0, %v31_v1 }
   0x5   :  { %15 = vsyncpa [#allocation5], 0  ;;  %172 = vperm.xlu1 %385, %v39_v4   ;;  %v40_v6 = vld [vmem:[%s604_s3 + $0x8] sm:$0xff]  ;;  %v518_v7 = vld [vmem:[%s606_s5] sm:$0xff]  ;;  %v195_v10 = vlaneseq  ;;  %vm443_vm5 = vmmov 1   ;;  %vm217_vm7 = vcmask 130048  }
   0x6   :  { %v524_v8 = vld [vmem:[%s606_s5 + $0x8] sm:$0xff]  ;;  %v358_v13 = vld [vmem:[%s605_s4] ss:$0 sm:$0xff]  ;;  %v444_v22 = vmov 0.0   ;;  %s446_s23 = smov [#allocation4]  }
   0x7   :  { %371 = vmatpush3.xpose.msk.msra.mxu0 %vm45_vm0, %v31_v1  ;;  %140 = vperm.xlu0 %384, %v37_v5   ;;  %v196_v14 = vand.u32 127, %v195_v10  ;;  %v198_v15 = vshrl.u32 %v195_v10, 7  ;;  %v359_v16 = vld [vmem:[%s607_s6] ss:$0 sm:$0xff]  ;;  %s341_s24 = sshll.u32 %s446_s23, 4  ;;  %s342_s24 = int_to_ptr.vmem [resolvable:$true] %s341_s24 }
   0x8   :  { %v357_v34 = vld [vmem:[%s603_s2] ss:$0 sm:$0xff]  ;;  %s445_s2 = smov [#allocation2]  }
   0x9   :  { %175 = vperm.xlu1 %385, %v40_v6   ;;  %vm203_vm3 = vcmp.ne.s32.totalorder %v196_v14, %v198_v15  ;;  %v199_v19 = vadd.s32 8, %v198_v15  ;;  %s331_s6 = sshll.u32 %s445_s2, 4  ;;  %s332_s6 = int_to_ptr.vmem [resolvable:$true] %s331_s6 }
   0xa   :  { %373 = vmatmul.mubr.msk.f32.vlgmr.msra.gmra.mxu0 %vm45_vm0, %v32_v0  ;;  %s398_s26 = scalar_lea.vmem %s332_s6, 16  ;;  %s402_s27 = scalar_lea.vmem %s332_s6, 32 }
   0xb   :  { %184 = vperm.xlu0 %384, %v518_v7   ;;  %vm204_vm12 = vcmp.ne.s32.totalorder %v196_v14, %v199_v19  ;;  %p399_p0 = scmp.ne.s32.totalorder %s332_s6, %s398_s26  ;;  %p403_p1 = scmp.lt.s32.totalorder %s332_s6, %s332_s6 }
   0xc   :  { %p404_p2 = scmp.lt.s32.totalorder %s402_s27, %s398_s26 }
   0xd   :  { %187 = vperm.xlu1 %385, %v524_v8  }
   0xe   :  { %p405_p3 = por %p404_p2, %p403_p1 }
  0x10   :  { %p406_p4 = pnand %p405_p3, %p399_p0 }
  0x7e   :  { %v136_v9 = vpop.permute.xlu0 %135 }
  0x7f   :  { %v149_v39 = vadd.f32 %v357_v34, %v136_v9 }
  0x80   :  { %v173_v11 = vpop.permute.xlu1 %172 }
  0x81   :  { %vm181_vm1 = vcmp.eq.s32.totalorder %v173_v11, %v358_v13 }
  0x82   :  { %v141_v12 = vpop.permute.xlu0 %140 }
  0x83   :  { %v150_v36 = vadd.f32 %v357_v34, %v141_v12 }
  0x84   :  { %v176_v17 = vpop.permute.xlu1 %175 }
  0x85   :  { %vm182_vm8 = vcmp.eq.s32.totalorder %v176_v17, %v358_v13 }
  0x86   :  { %v185_v18 = vpop.permute.xlu0 %184 }
  0x87   :  { %vm193_vm2 = vcmp.eq.s32.totalorder %v185_v18, %v359_v16 }
  0x88   :  { %vm205_vm4 = vmand %vm181_vm1, %vm193_vm2  ;;  %v188_v20 = vpop.permute.xlu1 %187 }
  0x89   :  { %vm209_vm6 = vmxor %vm193_vm2, %vm443_vm5  ;;  %vm194_vm9 = vcmp.eq.s32.totalorder %v188_v20, %v359_v16 }
  0x8a   :  { %vm535_vm10 = vmand %vm205_vm4, %vm203_vm3 }
  0x8b   :  { %v360_v23 = vsel %vm535_vm10, 1.0, %v444_v22  ;;  %vm543_vm11 = vmand %vm181_vm1, %vm209_vm6 }
  0x8c   :  { %v218_v25 = vsel %vm217_vm7, %v360_v23, 0.0  ;;  %v362_v26 = vsel %vm543_vm11, 1.0, %v444_v22  ;;  %vm206_vm13 = vmand %vm182_vm8, %vm194_vm9 }
  0x8d   :  { %219 = vadd.xlane.f32.xlu0 %v218_v25  ;;  %vm210_vm14 = vmxor %vm194_vm9, %vm443_vm5  ;;  %v228_v27 = vsel %vm217_vm7, %v362_v26, 0.0 }
  0x8e   :  { %vm553_vm15 = vmand %vm206_vm13, %vm204_vm12  ;;  %vm295_vm12 = vcmp.eq.s32.totalorder %v524_v8, 1  ;;  %vm276_vm13 = vcmp.eq.s32.totalorder %v518_v7, 0 }
  0x8f   :  { %v361_v29 = vsel %vm553_vm15, 1.0, %v444_v22  ;;  %vm561_vm0 = vmand %vm182_vm8, %vm210_vm14  ;;  %vm294_vm14 = vcmp.eq.s32.totalorder %v518_v7, 1 }
  0x90   :  { %v221_v31 = vsel %vm217_vm7, %v361_v29, 0.0  ;;  %v363_v32 = vsel %vm561_vm0, 1.0, %v444_v22 }
  0x91   :  { %229 = vadd.xlane.f32.xlu0 %v228_v27  ;;  %222 = vadd.xlane.f32.xlu1 %v221_v31  ;;  %v231_v33 = vsel %vm217_vm7, %v363_v32, 0.0 }
  0x95   :  { %232 = vadd.xlane.f32.xlu0 %v231_v33 }
  0xca   :  { %v374_v35 = vpop.f32.mrf.mxu0 }
  0xcb   :  { %v152_v37 = vmul.f32 2.0, %v374_v35 }
  0xcc   :  { %v124_v38 = vpop.f32.mrf.mxu0 }
  0xcd   :  { %v154_v40 = vsub.f32 %v150_v36, %v152_v37  ;;  %v151_v41 = vmul.f32 2.0, %v124_v38 }
  0xcf   :  { %v156_v42 = vmax.f32 %v154_v40, 1e-12  ;;  %v153_v43 = vsub.f32 %v149_v39, %v151_v41 }
  0xd1   :  { %386 = vrsqrt.f32 %v156_v42  ;;  %v155_v44 = vmax.f32 %v153_v43, 1e-12  ;;  %vm166_vm1 = vcmp.eq.f32.partialorder %v156_v42, inf  ;;  %v169_v48 = vand.u32 2147483648, %v156_v42 }
  0xd2   :  { %vm168_vm2 = vcmp.eq.f32.partialorder %v156_v42, 0.0 }
  0xd3   :  { %388 = vrsqrt.f32 %v155_v44  ;;  %vm159_vm3 = vcmp.eq.f32.partialorder %v155_v44, inf  ;;  %v162_v52 = vand.u32 2147483648, %v155_v44  ;;  %vm161_vm4 = vcmp.eq.f32.partialorder %v155_v44, 0.0 }
  0xde   :  { %v387_v45 = vpop.eup %386 }
  0xdf   :  { %v165_v46 = vmul.f32 %v387_v45, %v156_v42 }
  0xe0   :  { %v389_v47 = vpop.eup %388 }
  0xe1   :  { %v167_v49 = vsel %vm166_vm1, %v156_v42, %v165_v46  ;;  %v158_v50 = vmul.f32 %v389_v47, %v155_v44 }
  0xe2   :  { %v170_v51 = vsel %vm168_vm2, %v169_v48, %v167_v49 }
  0xe3   :  { %v235_v53 = vsel %vm553_vm15, %v170_v51, 0.0  ;;  %v160_v54 = vsel %vm159_vm3, %v155_v44, %v158_v50  ;;  %v243_v58 = vsel %vm561_vm0, %v170_v51, 0.0  ;;  %vm280_vm15 = vcmask 7168  }
  0xe4   :  { %v239_v55 = vsel %vm217_vm7, %v235_v53, 0.0  ;;  %v163_v56 = vsel %vm161_vm4, %v162_v52, %v160_v54  ;;  %v247_v61 = vsel %vm217_vm7, %v243_v58, 0.0  ;;  %vm315_vm0 = vcmask 0  }
  0xe5   :  { %240 = vadd.xlane.f32.xlu0 %v239_v55  ;;  %v234_v57 = vsel %vm535_vm10, %v163_v56, 0.0  ;;  %v242_v60 = vsel %vm543_vm11, %v163_v56, 0.0  ;;  %vm277_vm11 = vcmp.eq.s32.totalorder %v524_v8, 0  ;;  %316 = vst.msk [vmem:[#allocation2] sm:$0x1] %vm315_vm0, %v444_v22 }
  0xe6   :  { %v236_v59 = vsel %vm217_vm7, %v234_v57, 0.0  ;;  %v244_v62 = vsel %vm217_vm7, %v242_v60, 0.0  ;;  %317 = vst.msk [vmem:[#allocation4] sm:$0x1] %vm315_vm0, %v444_v22 }
  0xe7   :  { %237 = vadd.xlane.f32.xlu1 %v236_v59 }
  0xe9   :  { %248 = vadd.xlane.f32.xlu0 %v247_v61 }
  0xeb   :  { %245 = vadd.xlane.f32.xlu1 %v244_v62 }
  0xec   :  { %v318_v52 = vld [vmem:[#allocation2] sm:$0x1] }
  0xed   :  { %v322_v22 = vld [vmem:[#allocation4] sm:$0x1] }
 0x116   :  { %v220_v63 = vpop.xlane.xlu0 %219 }
 0x117   :  { %v256_v4 = vmax.f32 %v220_v63, 1.0  ;;  %vm250_vm7 = vcmp.gt.f32.partialorder %v220_v63, 0.0 }
 0x11a   :  { %v230_v0 = vpop.xlane.xlu0 %229  ;;  %v223_v1 = vpop.xlane.xlu1 %222 }
 0x11b   :  { %v257_v3 = vmax.f32 %v223_v1, 1.0  ;;  %v264_v6 = vmax.f32 %v230_v0, 1.0  ;;  %vm251_vm5 = vcmp.gt.f32.partialorder %v223_v1, 0.0  ;;  %vm252_vm8 = vcmp.gt.f32.partialorder %v230_v0, 0.0 }
 0x11c   :  { %vm254_vm10 = vmand %vm250_vm7, %vm252_vm8 }
 0x11d   :  { %390 = vrcp.f32 %v257_v3 }
 0x11e   :  { %v233_v2 = vpop.xlane.xlu0 %232  ;;  %392 = vrcp.f32 %v256_v4 }
 0x11f   :  { %v265_v5 = vmax.f32 %v233_v2, 1.0  ;;  %vm253_vm6 = vcmp.gt.f32.partialorder %v233_v2, 0.0 }
 0x120   :  { %vm255_vm9 = vmand %vm251_vm5, %vm253_vm6 }
 0x121   :  { %394 = vrcp.f32 %v265_v5 }
 0x122   :  { %396 = vrcp.f32 %v264_v6 }
 0x12a   :  { %v391_v10 = vpop.eup %390 }
 0x12b   :  { %v393_v12 = vpop.eup %392 }
 0x12e   :  { %v395_v14 = vpop.eup %394 }
 0x12f   :  { %v397_v18 = vpop.eup %396 }
 0x16e   :  { %v241_v9 = vpop.xlane.xlu0 %240 }
 0x16f   :  { %v261_v13 = vmul.f32 %v391_v10, %v241_v9 }
 0x170   :  { %v238_v11 = vpop.xlane.xlu1 %237 }
 0x171   :  { %v259_v16 = vmul.f32 %v393_v12, %v238_v11  ;;  %v263_v20 = vsel %vm255_vm9, %v261_v13, 0.0 }
 0x172   :  { %v249_v15 = vpop.xlane.xlu0 %248 }
 0x173   :  { %v269_v17 = vmul.f32 %v395_v14, %v249_v15  ;;  %v262_v25 = vsel %vm254_vm10, %v259_v16, 0.0 }
 0x174   :  { %v246_v19 = vpop.xlane.xlu1 %245 }
 0x175   :  { %v271_v21 = vsel %vm255_vm9, %v269_v17, 0.0  ;;  %v267_v23 = vmul.f32 %v397_v18, %v246_v19 }
 0x176   :  { %v273_v24 = vsub.f32 %v271_v21, %v263_v20 }
 0x177   :  { %v270_v26 = vsel %vm254_vm10, %v267_v23, 0.0 }
 0x178   :  { %v275_v27 = vmul.f32 %v273_v24, %v273_v24  ;;  %v272_v28 = vsub.f32 %v270_v26, %v262_v25 }
 0x17a   :  { %v274_v29 = vmul.f32 %v272_v28, %v272_v28  ;;  %v297_v30 = vsel %vm295_vm12, %v275_v27, 0.0  ;;  %v279_v31 = vsel %vm277_vm11, %v275_v27, 0.0 }
 0x17b   :  { %v299_v35 = vsel %vm280_vm15, %v297_v30, 0.0  ;;  %v282_v37 = vsel %vm280_vm15, %v279_v31, 0.0 }
 0x17c   :  { %v296_v32 = vsel %vm294_vm14, %v274_v29, 0.0  ;;  %v278_v33 = vsel %vm276_vm13, %v274_v29, 0.0 }
 0x17d   :  { %v298_v34 = vsel %vm280_vm15, %v296_v32, 0.0  ;;  %v281_v36 = vsel %vm280_vm15, %v278_v33, 0.0 }
 0x17e   :  { %v300_v38 = vadd.f32 %v299_v35, %v298_v34  ;;  %v283_v8 = vadd.f32 %v282_v37, %v281_v36 }
 0x180   :  { %301 = vadd.xlane.f32.xlu0 %v300_v38  ;;  %284 = vadd.xlane.f32.xlu1 %v283_v8 }
 0x209   :  { %v302_v7 = vpop.xlane.xlu0 %301  ;;  %v285_v39 = vpop.xlane.xlu1 %284 }
 0x20a   :  { %v303_v40 = vrot.slane %v302_v7, 4  ;;  %v286_v41 = vrot.slane %v285_v39, 4 }
 0x20c   :  { %v304_v42 = vadd.f32 %v303_v40, %v302_v7  ;;  %v287_v43 = vadd.f32 %v286_v41, %v285_v39 }
 0x20e   :  { %v305_v44 = vrot.slane %v304_v42, 2  ;;  %v288_v45 = vrot.slane %v287_v43, 2 }
 0x210   :  { %v306_v46 = vadd.f32 %v305_v44, %v304_v42  ;;  %v289_v47 = vadd.f32 %v288_v45, %v287_v43 }
 0x212   :  { %v290_v48 = vrot.slane %v289_v47, 1  ;;  %v307_v49 = vrot.slane %v306_v46, 1 }
 0x214   :  { %v291_v50 = vadd.f32 %v290_v48, %v289_v47  ;;  %v308_v51 = vadd.f32 %v307_v49, %v306_v46 }
 0x216   :  { %375 = vpush %v291_v50 }
 0x217   :  { %377 = vpush %v308_v51 }
 0x247   :  { %s376_s22 = spop %375 }
 0x248   :  { %v293_v53 = vstv %s376_s22  ;;  %s378_s25 = spop %377 }
 0x249   :  { %v319_v54 = vadd.f32 %v318_v52, %v293_v53  ;;  %v310_v55 = vstv %s378_s25 }
 0x24a   :  { %v323_v56 = vadd.f32 %v322_v22, %v310_v55 }
 0x24b   :  { %321 = vst.msk [vmem:[#allocation2] sm:$0x1] %vm315_vm0, %v319_v54 }
 0x24c   :  { %324 = vst.msk [vmem:[#allocation4] sm:$0x1] %vm315_vm0, %v323_v56 }
 0x24d   :  { %409 = shalt.err (!%p406_p4)
}
 0x24e   :  { %334 = dma.vmem_to_hbm [thread:$0]  %s332_s6, 16, %s608_s7, [#allocation3]  }
 0x24f   :  { %s418_s30 = scalar_lea.vmem %s342_s24, 16  ;;  %s422_s9 = scalar_lea.vmem %s342_s24, 32 }
 0x250   :  { %p419_p5 = scmp.ne.s32.totalorder %s342_s24, %s418_s30  ;;  %p423_p6 = scmp.lt.s32.totalorder %s342_s24, %s342_s24 }
 0x251   :  { %p424_p7 = scmp.lt.s32.totalorder %s422_s9, %s418_s30 }
 0x253   :  { %p425_p8 = por %p424_p7, %p423_p6 }
 0x255   :  { %p426_p9 = pnand %p425_p8, %p419_p5 }
 0x257   :  { %429 = shalt.err (!%p426_p9)
}
 0x258   :  { %344 = dma.vmem_to_hbm [thread:$0]  %s342_s24, 16, %s609_s8, [#allocation5]  }
 0x259   :  { %438 = dma.done.wait [#allocation3], 16  }
 0x25a   :  { %439 = vsyncadd [#allocation3], 4294967280 }
 0x25b   :  { %440 = dma.done.wait [#allocation5], 16  }
 0x25c   :  { %441 = vsyncadd [#allocation5], 4294967280 }
 0x25d   :  { %351 = vsyncpa [#allocation3], 1 }
 0x25e   :  { %352 = vsyncpa [#allocation5], 1 }

// kernel: tpu_custom_call.1
= control target key start
LH: loop header
LB: loop body
LE: loop exit
PB: predicated region body
PF: predicated region fallthrough
CT: control target
= control target key end

     0   :  { %14 = vsyncpa [#allocation3], 0  ;;  %vm45_vm0 = vcmask 261120   ;;  %v442_v3 = vmov 0   ;;  %s601_s0 = inlined_call_operand.vmem [shape: f32[16,32], index: 0, kind: input, shape index: {}]   ;;  %s602_s1 = inlined_call_operand.vmem [shape: f32[16,1], index: 1, kind: input, shape index: {}]   ;;  %s603_s2 = inlined_call_operand.vmem [shape: f32[1,16], index: 2, kind: input, shape index: {}]   ;;  %s604_s3 = inlined_call_operand.vmem [shape: s32[16,1], index: 3, kind: input, shape index: {}]   ;;  %s605_s4 = inlined_call_operand.vmem [shape: s32[1,16], index: 4, kind: input, shape index: {}]   ;;  %s606_s5 = inlined_call_operand.vmem [shape: s32[16,1], index: 5, kind: input, shape index: {}]   ;;  %s607_s6 = inlined_call_operand.vmem [shape: s32[1,16], index: 6, kind: input, shape index: {}]   ;;  %s608_s7 = inlined_call_operand.hbm [shape: f32[1,1], index: 7, kind: output, shape index: {0}]   ;;  %s609_s8 = inlined_call_operand.hbm [shape: f32[1,1], index: 8, kind: output, shape index: {1}]  }
   0x1   :  { %v32_v0 = vld [vmem:[%s601_s0 + $0x8] sm:$0xff]  ;;  %v31_v1 = vld [vmem:[%s601_s0] sm:$0xff]  ;;  %384 = vset.pattern.permute.xlu0 %v442_v3  ;;  %385 = vset.pattern.permute.xlu1 %v442_v3 }
   0x2   :  { %v36_v2 = vld [vmem:[%s602_s1] sm:$0xff]  ;;  %368 = vmatprep.subr.msk.mxu0 %vm45_vm0, %v32_v0  ;;  %372 = vmatprep.mubr.msk.f32.mxu0 %vm45_vm0, %v31_v1  ;;  %v37_v5 = vld [vmem:[%s602_s1 + $0x8] sm:$0xff] }
   0x3   :  { %369 = vmatpush3.xpose.msk.msra.mxu0 %vm45_vm0, %v32_v0  ;;  %v39_v4 = vld [vmem:[%s604_s3] sm:$0xff]  ;;  %135 = vperm.xlu0 %384, %v36_v2  }
   0x4   :  { %370 = vmatprep.subr.msk.mxu0 %vm45_vm0, %v31_v1 }
   0x5   :  { %15 = vsyncpa [#allocation5], 0  ;;  %172 = vperm.xlu1 %385, %v39_v4   ;;  %v40_v6 = vld [vmem:[%s604_s3 + $0x8] sm:$0xff]  ;;  %v518_v7 = vld [vmem:[%s606_s5] sm:$0xff]  ;;  %v195_v10 = vlaneseq  ;;  %vm443_vm5 = vmmov 1   ;;  %vm217_vm7 = vcmask 130048  }
   0x6   :  { %v524_v8 = vld [vmem:[%s606_s5 + $0x8] sm:$0xff]  ;;  %v358_v13 = vld [vmem:[%s605_s4] ss:$0 sm:$0xff]  ;;  %v444_v22 = vmov 0.0   ;;  %s446_s23 = smov [#allocation4]  }
   0x7   :  { %371 = vmatpush3.xpose.msk.msra.mxu0 %vm45_vm0, %v31_v1  ;;  %140 = vperm.xlu0 %384, %v37_v5   ;;  %v196_v14 = vand.u32 127, %v195_v10  ;;  %v198_v15 = vshrl.u32 %v195_v10, 7  ;;  %v359_v16 = vld [vmem:[%s607_s6] ss:$0 sm:$0xff]  ;;  %s341_s24 = sshll.u32 %s446_s23, 4  ;;  %s342_s24 = int_to_ptr.vmem [resolvable:$true] %s341_s24 }
   0x8   :  { %v357_v34 = vld [vmem:[%s603_s2] ss:$0 sm:$0xff]  ;;  %s445_s2 = smov [#allocation2]  }
   0x9   :  { %175 = vperm.xlu1 %385, %v40_v6   ;;  %vm203_vm3 = vcmp.ne.s32.totalorder %v196_v14, %v198_v15  ;;  %v199_v19 = vadd.s32 8, %v198_v15  ;;  %s331_s6 = sshll.u32 %s445_s2, 4  ;;  %s332_s6 = int_to_ptr.vmem [resolvable:$true] %s331_s6 }
   0xa   :  { %373 = vmatmul.mubr.msk.f32.vlgmr.msra.gmra.mxu0 %vm45_vm0, %v32_v0  ;;  %s398_s26 = scalar_lea.vmem %s332_s6, 16  ;;  %s402_s27 = scalar_lea.vmem %s332_s6, 32 }
   0xb   :  { %184 = vperm.xlu0 %384, %v518_v7   ;;  %vm204_vm12 = vcmp.ne.s32.totalorder %v196_v14, %v199_v19  ;;  %p399_p0 = scmp.ne.s32.totalorder %s332_s6, %s398_s26  ;;  %p403_p1 = scmp.lt.s32.totalorder %s332_s6, %s332_s6 }
   0xc   :  { %p404_p2 = scmp.lt.s32.totalorder %s402_s27, %s398_s26 }
   0xd   :  { %187 = vperm.xlu1 %385, %v524_v8  }
   0xe   :  { %p405_p3 = por %p404_p2, %p403_p1 }
  0x10   :  { %p406_p4 = pnand %p405_p3, %p399_p0 }
  0x7e   :  { %v136_v9 = vpop.permute.xlu0 %135 }
  0x7f   :  { %v149_v39 = vadd.f32 %v357_v34, %v136_v9 }
  0x80   :  { %v173_v11 = vpop.permute.xlu1 %172 }
  0x81   :  { %vm181_vm1 = vcmp.eq.s32.totalorder %v173_v11, %v358_v13 }
  0x82   :  { %v141_v12 = vpop.permute.xlu0 %140 }
  0x83   :  { %v150_v36 = vadd.f32 %v357_v34, %v141_v12 }
  0x84   :  { %v176_v17 = vpop.permute.xlu1 %175 }
  0x85   :  { %vm182_vm8 = vcmp.eq.s32.totalorder %v176_v17, %v358_v13 }
  0x86   :  { %v185_v18 = vpop.permute.xlu0 %184 }
  0x87   :  { %vm193_vm2 = vcmp.eq.s32.totalorder %v185_v18, %v359_v16 }
  0x88   :  { %vm205_vm4 = vmand %vm181_vm1, %vm193_vm2  ;;  %v188_v20 = vpop.permute.xlu1 %187 }
  0x89   :  { %vm209_vm6 = vmxor %vm193_vm2, %vm443_vm5  ;;  %vm194_vm9 = vcmp.eq.s32.totalorder %v188_v20, %v359_v16 }
  0x8a   :  { %vm535_vm10 = vmand %vm205_vm4, %vm203_vm3 }
  0x8b   :  { %v360_v23 = vsel %vm535_vm10, 1.0, %v444_v22  ;;  %vm543_vm11 = vmand %vm181_vm1, %vm209_vm6 }
  0x8c   :  { %v218_v25 = vsel %vm217_vm7, %v360_v23, 0.0  ;;  %v362_v26 = vsel %vm543_vm11, 1.0, %v444_v22  ;;  %vm206_vm13 = vmand %vm182_vm8, %vm194_vm9 }
  0x8d   :  { %219 = vadd.xlane.f32.xlu0 %v218_v25  ;;  %vm210_vm14 = vmxor %vm194_vm9, %vm443_vm5  ;;  %v228_v27 = vsel %vm217_vm7, %v362_v26, 0.0 }
  0x8e   :  { %vm553_vm15 = vmand %vm206_vm13, %vm204_vm12  ;;  %vm295_vm12 = vcmp.eq.s32.totalorder %v524_v8, 1  ;;  %vm276_vm13 = vcmp.eq.s32.totalorder %v518_v7, 0 }
  0x8f   :  { %v361_v29 = vsel %vm553_vm15, 1.0, %v444_v22  ;;  %vm561_vm0 = vmand %vm182_vm8, %vm210_vm14  ;;  %vm294_vm14 = vcmp.eq.s32.totalorder %v518_v7, 1 }
  0x90   :  { %v221_v31 = vsel %vm217_vm7, %v361_v29, 0.0  ;;  %v363_v32 = vsel %vm561_vm0, 1.0, %v444_v22 }
  0x91   :  { %229 = vadd.xlane.f32.xlu0 %v228_v27  ;;  %222 = vadd.xlane.f32.xlu1 %v221_v31  ;;  %v231_v33 = vsel %vm217_vm7, %v363_v32, 0.0 }
  0x95   :  { %232 = vadd.xlane.f32.xlu0 %v231_v33 }
  0xca   :  { %v374_v35 = vpop.f32.mrf.mxu0 }
  0xcb   :  { %v152_v37 = vmul.f32 2.0, %v374_v35 }
  0xcc   :  { %v124_v38 = vpop.f32.mrf.mxu0 }
  0xcd   :  { %v154_v40 = vsub.f32 %v150_v36, %v152_v37  ;;  %v151_v41 = vmul.f32 2.0, %v124_v38 }
  0xcf   :  { %v156_v42 = vmax.f32 %v154_v40, 1e-12  ;;  %v153_v43 = vsub.f32 %v149_v39, %v151_v41 }
  0xd1   :  { %386 = vrsqrt.f32 %v156_v42  ;;  %v155_v44 = vmax.f32 %v153_v43, 1e-12  ;;  %vm166_vm1 = vcmp.eq.f32.partialorder %v156_v42, inf  ;;  %v169_v48 = vand.u32 2147483648, %v156_v42 }
  0xd2   :  { %vm168_vm2 = vcmp.eq.f32.partialorder %v156_v42, 0.0 }
  0xd3   :  { %388 = vrsqrt.f32 %v155_v44  ;;  %vm159_vm3 = vcmp.eq.f32.partialorder %v155_v44, inf  ;;  %v162_v52 = vand.u32 2147483648, %v155_v44  ;;  %vm161_vm4 = vcmp.eq.f32.partialorder %v155_v44, 0.0 }
  0xde   :  { %v387_v45 = vpop.eup %386 }
  0xdf   :  { %v165_v46 = vmul.f32 %v387_v45, %v156_v42 }
  0xe0   :  { %v389_v47 = vpop.eup %388 }
  0xe1   :  { %v167_v49 = vsel %vm166_vm1, %v156_v42, %v165_v46  ;;  %v158_v50 = vmul.f32 %v389_v47, %v155_v44 }
  0xe2   :  { %v170_v51 = vsel %vm168_vm2, %v169_v48, %v167_v49 }
  0xe3   :  { %v235_v53 = vsel %vm553_vm15, %v170_v51, 0.0  ;;  %v160_v54 = vsel %vm159_vm3, %v155_v44, %v158_v50  ;;  %v243_v58 = vsel %vm561_vm0, %v170_v51, 0.0  ;;  %vm280_vm15 = vcmask 7168  }
  0xe4   :  { %v239_v55 = vsel %vm217_vm7, %v235_v53, 0.0  ;;  %v163_v56 = vsel %vm161_vm4, %v162_v52, %v160_v54  ;;  %v247_v61 = vsel %vm217_vm7, %v243_v58, 0.0  ;;  %vm315_vm0 = vcmask 0  }
  0xe5   :  { %240 = vadd.xlane.f32.xlu0 %v239_v55  ;;  %v234_v57 = vsel %vm535_vm10, %v163_v56, 0.0  ;;  %v242_v60 = vsel %vm543_vm11, %v163_v56, 0.0  ;;  %vm277_vm11 = vcmp.eq.s32.totalorder %v524_v8, 0  ;;  %316 = vst.msk [vmem:[#allocation2] sm:$0x1] %vm315_vm0, %v444_v22 }
  0xe6   :  { %v236_v59 = vsel %vm217_vm7, %v234_v57, 0.0  ;;  %v244_v62 = vsel %vm217_vm7, %v242_v60, 0.0  ;;  %317 = vst.msk [vmem:[#allocation4] sm:$0x1] %vm315_vm0, %v444_v22 }
  0xe7   :  { %237 = vadd.xlane.f32.xlu1 %v236_v59 }
  0xe9   :  { %248 = vadd.xlane.f32.xlu0 %v247_v61 }
  0xeb   :  { %245 = vadd.xlane.f32.xlu1 %v244_v62 }
  0xec   :  { %v318_v52 = vld [vmem:[#allocation2] sm:$0x1] }
  0xed   :  { %v322_v22 = vld [vmem:[#allocation4] sm:$0x1] }
 0x116   :  { %v220_v63 = vpop.xlane.xlu0 %219 }
 0x117   :  { %v256_v4 = vmax.f32 %v220_v63, 1.0  ;;  %vm250_vm7 = vcmp.gt.f32.partialorder %v220_v63, 0.0 }
 0x11a   :  { %v230_v0 = vpop.xlane.xlu0 %229  ;;  %v223_v1 = vpop.xlane.xlu1 %222 }
 0x11b   :  { %v257_v3 = vmax.f32 %v223_v1, 1.0  ;;  %v264_v6 = vmax.f32 %v230_v0, 1.0  ;;  %vm251_vm5 = vcmp.gt.f32.partialorder %v223_v1, 0.0  ;;  %vm252_vm8 = vcmp.gt.f32.partialorder %v230_v0, 0.0 }
 0x11c   :  { %vm254_vm10 = vmand %vm250_vm7, %vm252_vm8 }
 0x11d   :  { %390 = vrcp.f32 %v257_v3 }
 0x11e   :  { %v233_v2 = vpop.xlane.xlu0 %232  ;;  %392 = vrcp.f32 %v256_v4 }
 0x11f   :  { %v265_v5 = vmax.f32 %v233_v2, 1.0  ;;  %vm253_vm6 = vcmp.gt.f32.partialorder %v233_v2, 0.0 }
 0x120   :  { %vm255_vm9 = vmand %vm251_vm5, %vm253_vm6 }
 0x121   :  { %394 = vrcp.f32 %v265_v5 }
 0x122   :  { %396 = vrcp.f32 %v264_v6 }
 0x12a   :  { %v391_v10 = vpop.eup %390 }
 0x12b   :  { %v393_v12 = vpop.eup %392 }
 0x12e   :  { %v395_v14 = vpop.eup %394 }
 0x12f   :  { %v397_v18 = vpop.eup %396 }
 0x16e   :  { %v241_v9 = vpop.xlane.xlu0 %240 }
 0x16f   :  { %v261_v13 = vmul.f32 %v391_v10, %v241_v9 }
 0x170   :  { %v238_v11 = vpop.xlane.xlu1 %237 }
 0x171   :  { %v259_v16 = vmul.f32 %v393_v12, %v238_v11  ;;  %v263_v20 = vsel %vm255_vm9, %v261_v13, 0.0 }
 0x172   :  { %v249_v15 = vpop.xlane.xlu0 %248 }
 0x173   :  { %v269_v17 = vmul.f32 %v395_v14, %v249_v15  ;;  %v262_v25 = vsel %vm254_vm10, %v259_v16, 0.0 }
 0x174   :  { %v246_v19 = vpop.xlane.xlu1 %245 }
 0x175   :  { %v271_v21 = vsel %vm255_vm9, %v269_v17, 0.0  ;;  %v267_v23 = vmul.f32 %v397_v18, %v246_v19 }
 0x176   :  { %v273_v24 = vsub.f32 %v271_v21, %v263_v20 }
 0x177   :  { %v270_v26 = vsel %vm254_vm10, %v267_v23, 0.0 }
 0x178   :  { %v275_v27 = vmul.f32 %v273_v24, %v273_v24  ;;  %v272_v28 = vsub.f32 %v270_v26, %v262_v25 }
 0x17a   :  { %v274_v29 = vmul.f32 %v272_v28, %v272_v28  ;;  %v297_v30 = vsel %vm295_vm12, %v275_v27, 0.0  ;;  %v279_v31 = vsel %vm277_vm11, %v275_v27, 0.0 }
 0x17b   :  { %v299_v35 = vsel %vm280_vm15, %v297_v30, 0.0  ;;  %v282_v37 = vsel %vm280_vm15, %v279_v31, 0.0 }
 0x17c   :  { %v296_v32 = vsel %vm294_vm14, %v274_v29, 0.0  ;;  %v278_v33 = vsel %vm276_vm13, %v274_v29, 0.0 }
 0x17d   :  { %v298_v34 = vsel %vm280_vm15, %v296_v32, 0.0  ;;  %v281_v36 = vsel %vm280_vm15, %v278_v33, 0.0 }
 0x17e   :  { %v300_v38 = vadd.f32 %v299_v35, %v298_v34  ;;  %v283_v8 = vadd.f32 %v282_v37, %v281_v36 }
 0x180   :  { %301 = vadd.xlane.f32.xlu0 %v300_v38  ;;  %284 = vadd.xlane.f32.xlu1 %v283_v8 }
 0x209   :  { %v302_v7 = vpop.xlane.xlu0 %301  ;;  %v285_v39 = vpop.xlane.xlu1 %284 }
 0x20a   :  { %v303_v40 = vrot.slane %v302_v7, 4  ;;  %v286_v41 = vrot.slane %v285_v39, 4 }
 0x20c   :  { %v304_v42 = vadd.f32 %v303_v40, %v302_v7  ;;  %v287_v43 = vadd.f32 %v286_v41, %v285_v39 }
 0x20e   :  { %v305_v44 = vrot.slane %v304_v42, 2  ;;  %v288_v45 = vrot.slane %v287_v43, 2 }
 0x210   :  { %v306_v46 = vadd.f32 %v305_v44, %v304_v42  ;;  %v289_v47 = vadd.f32 %v288_v45, %v287_v43 }
 0x212   :  { %v290_v48 = vrot.slane %v289_v47, 1  ;;  %v307_v49 = vrot.slane %v306_v46, 1 }
 0x214   :  { %v291_v50 = vadd.f32 %v290_v48, %v289_v47  ;;  %v308_v51 = vadd.f32 %v307_v49, %v306_v46 }
 0x216   :  { %375 = vpush %v291_v50 }
 0x217   :  { %377 = vpush %v308_v51 }
 0x247   :  { %s376_s22 = spop %375 }
 0x248   :  { %v293_v53 = vstv %s376_s22  ;;  %s378_s25 = spop %377 }
 0x249   :  { %v319_v54 = vadd.f32 %v318_v52, %v293_v53  ;;  %v310_v55 = vstv %s378_s25 }
 0x24a   :  { %v323_v56 = vadd.f32 %v322_v22, %v310_v55 }
 0x24b   :  { %321 = vst.msk [vmem:[#allocation2] sm:$0x1] %vm315_vm0, %v319_v54 }
 0x24c   :  { %324 = vst.msk [vmem:[#allocation4] sm:$0x1] %vm315_vm0, %v323_v56 }
 0x24d   :  { %409 = shalt.err (!%p406_p4)
}
 0x24e   :  { %334 = dma.vmem_to_hbm [thread:$0]  %s332_s6, 16, %s608_s7, [#allocation3]  }
 0x24f   :  { %s418_s30 = scalar_lea.vmem %s342_s24, 16  ;;  %s422_s9 = scalar_lea.vmem %s342_s24, 32 }
 0x250   :  { %p419_p5 = scmp.ne.s32.totalorder %s342_s24, %s418_s30  ;;  %p423_p6 = scmp.lt.s32.totalorder %s342_s24, %s342_s24 }
 0x251   :  { %p424_p7 = scmp.lt.s32.totalorder %s422_s9, %s418_s30 }
 0x253   :  { %p425_p8 = por %p424_p7, %p423_p6 }
 0x255   :  { %p426_p9 = pnand %p425_p8, %p419_p5 }
 0x257   :  { %429 = shalt.err (!%p426_p9)
}
 0x258   :  { %344 = dma.vmem_to_hbm [thread:$0]  %s342_s24, 16, %s609_s8, [#allocation5]  }
 0x259   :  { %438 = dma.done.wait [#allocation3], 16  }
 0x25a   :  { %439 = vsyncadd [#allocation3], 4294967280 }
 0x25b   :  { %440 = dma.done.wait [#allocation5], 16  }
 0x25c   :  { %441 = vsyncadd [#allocation5], 4294967280 }
 0x25d   :  { %351 = vsyncpa [#allocation3], 1 }
 0x25e   :  { %352 = vsyncpa [#allocation5], 1 }

</bundles_post_ra>
